<compile_context>
chip_gen: v7x
topology: tpu7x:2x2x1
jax: 0.10.0
libtpu: 0.0.40
codegen_flags: <defaults>
</compile_context>

<pallas_src>
import functools
import math

import jax
import jax.numpy as jnp
from jax import lax
from jax.experimental import pallas as pl
from jax.experimental.pallas import tpu as pltpu

P_DROP = 0.1
_KEEP_SCALE = 1.0 / (1.0 - P_DROP)
# keep iff (hash & 0x7FFFFFFF) >= threshold  =>  P(keep) = 1 - P_DROP
_DROP_THRESHOLD_31 = int(P_DROP * (1 << 31))
_GOLDEN = 0x9E3779B9
_M1 = 0x7FEB352D
_M2 = 0x846CA68B


def _mix32(x):
    """lowbias32-style integer hash -- pure 32-bit VPU ops."""
    x = x ^ (x >> 16)
    x = x * jnp.uint32(_M1)
    x = x ^ (x >> 15)
    x = x * jnp.uint32(_M2)
    x = x ^ (x >> 16)
    return x


def _attn_dropout_kernel(seed_ref, q_ref, k_ref, o_ref,
                         m_sc, l_sc, acc_sc, *, s_total, mask_k):
    # q_ref: (bb, tq, D) bf16, pre-scaled by 1/sqrt(D)
    # k_ref: (bb, tk, D) bf16
    # o_ref: (bb, tq, D) f32
    bb, tq, D = q_ref.shape
    tk = k_ref.shape[1]
    ki = pl.program_id(2)

    @pl.when(ki == 0)
    def _():
        m_sc[...] = jnp.full(m_sc.shape, -jnp.inf, dtype=m_sc.dtype)
        l_sc[...] = jnp.zeros(l_sc.shape, dtype=l_sc.dtype)
        acc_sc[...] = jnp.zeros(acc_sc.shape, dtype=acc_sc.dtype)

    q = q_ref[...]
    k = k_ref[...]

    # scores (bb, tq, tk): contract last axes of both operands (no explicit k.T).
    s = lax.dot_general(
        q, k,
        dimension_numbers=(((2,), (2,)), ((0,), (0,))),
        preferred_element_type=jnp.float32,
    )

    # Mask out-of-range k columns when S % tk != 0 (statically known).
    if mask_k:
        k_pos = lax.broadcasted_iota(jnp.int32, (1, 1, tk), 2) + ki * tk
        s = jnp.where(k_pos < s_total, s, -jnp.inf)

    # Online softmax update.  The denominator accumulates over ALL columns
    # (dropout happens after normalization in the reference module).
    m_prev = m_sc[...]
    m_new = jnp.maximum(m_prev, jnp.max(s, axis=-1, keepdims=True))
    alpha = jnp.exp(m_prev - m_new)                 # 0 at ki==0 (m_prev=-inf)
    p = jnp.exp(s - m_new)                          # f32, (bb, tq, tk)
    l_sc[...] = alpha * l_sc[...] + jnp.sum(p, axis=-1, keepdims=True)

    # Dropout keep-mask: counter hash on GLOBAL (batch, q, k) indices so the
    # mask does not depend on the tiling.  Heavy mixing only on (bb,tq,1) and
    # (1,1,tk); per-element cost = add + one xorshift-multiply round.
    seed = seed_ref[0].astype(jnp.uint32)
    b0 = (pl.program_id(0) * bb).astype(jnp.uint32)
    q0 = (pl.program_id(1) * tq).astype(jnp.uint32)
    k0 = (ki * tk).astype(jnp.uint32)

    row_shape = (bb, tq, 1)
    b_idx = lax.broadcasted_iota(jnp.uint32, row_shape, 0) + b0
    q_idx = lax.broadcasted_iota(jnp.uint32, row_shape, 1) + q0
    row_h = _mix32((b_idx * jnp.uint32(s_total) + q_idx)
                   ^ (seed * jnp.uint32(_GOLDEN)))

    k_idx = lax.broadcasted_iota(jnp.uint32, (1, 1, tk), 2) + k0
    col_h = _mix32(k_idx * jnp.uint32(_GOLDEN) + jnp.uint32(1))

    h = row_h + col_h                               # broadcast -> (bb, tq, tk)
    h = h ^ (h >> 16)
    h = h * jnp.uint32(_M1)
    h = h ^ (h >> 15)
    h31 = (h & jnp.uint32(0x7FFFFFFF)).astype(jnp.int32)   # signed-safe compare
    keep = h31 >= jnp.int32(_DROP_THRESHOLD_31)            # P(keep) = 1 - P_DROP

    p_kept = jnp.where(keep, p, 0.0).astype(jnp.bfloat16)

    # output accumulator: sum_k keep*exp(s-m) * V   (V == k in this module)
    acc_sc[...] = alpha * acc_sc[...] + lax.dot_general(
        p_kept, k,
        dimension_numbers=(((2,), (1,)), ((0,), (0,))),
        preferred_element_type=jnp.float32,
    )
    m_sc[...] = m_new

    @pl.when(ki == pl.num_programs(2) - 1)
    def _():
        # Deferred softmax normalization + dropout rescale on the small tile.
        inv = pl.reciprocal(l_sc[...], approx=True) * _KEEP_SCALE
        o_ref[...] = (acc_sc[...] * inv).astype(o_ref.dtype)


def attention_dropout(q, k, seed, *, block_b=None, block_q=None, block_k=None):
    """Forward of the PyTorch Model: dropout(softmax(q @ k^T / sqrt(D))) @ k.

    q, k: (B, S, D) float32.  seed: (1,) int32 deterministic dropout seed.
    """
    B, S, D = q.shape
    assert k.shape == (B, S, D)

    # Tile selection: small batch block, bounded q/k tiles (K streamed on a
    # third "arbitrary" grid axis when S > tk).
    bb = block_b if block_b is not None else 1
    tq = block_q if block_q is not None else (S if S <= 256 else 256)
    tk = block_k if block_k is not None else (S if S <= 512 else 512)
    grid = (pl.cdiv(B, bb), pl.cdiv(S, tq), pl.cdiv(S, tk))

    # bf16 inputs (scale folded into q) -> half DMA bytes, half K VMEM tile.
    scale = 1.0 / math.sqrt(D)
    q_bf = (q * jnp.float32(scale)).astype(jnp.bfloat16)
    k_bf = k.astype(jnp.bfloat16)

    kernel = functools.partial(_attn_dropout_kernel,
                               s_total=S, mask_k=(S % tk != 0))

    q_spec = pl.BlockSpec((bb, tq, D), lambda bi, qi, ki, seed_ref: (bi, qi, 0))
    k_spec = pl.BlockSpec((bb, tk, D), lambda bi, qi, ki, seed_ref: (bi, ki, 0))
    o_spec = pl.BlockSpec((bb, tq, D), lambda bi, qi, ki, seed_ref: (bi, qi, 0))

    # Rough VMEM working-set estimate for the chosen tiles (double-buffered
    # q/k/out + scratch + f32 (bb,tq,tk) temporaries), with slack.
    est = (2 * bb * tq * D * 2        # q, double-buffered bf16
           + 2 * bb * tk * D * 2      # k, double-buffered bf16
           + 2 * bb * tq * D * 4      # out, double-buffered f32
           + bb * tq * D * 4          # acc scratch
           + 4 * bb * tq * 4          # m/l scratch (padded)
           + 8 * bb * tq * tk * 4)    # score/exp/mask temporaries
    vmem_limit = int(min(48 << 20, max(24 << 20, 2 * est)))

    cost = pl.CostEstimate(
        flops=4 * B * S * S * D,                      # two matmuls
        transcendentals=B * S * S,                    # exp
        bytes_accessed=(B * S * D * 2                 # q (bf16)
                        + pl.cdiv(S, tq) * B * S * D * 2  # k re-read per q tile
                        + B * S * D * 4),             # out (f32)
    )

    return pl.pallas_call(
        kernel,
        out_shape=jax.ShapeDtypeStruct((B, S, D), q.dtype),
        grid_spec=pltpu.PrefetchScalarGridSpec(
            num_scalar_prefetch=1,
            grid=grid,
            in_specs=[q_spec, k_spec],
            out_specs=o_spec,
            scratch_shapes=[
                pltpu.VMEM((bb, tq, 1), jnp.float32),   # running max
                pltpu.VMEM((bb, tq, 1), jnp.float32),   # running denominator
                pltpu.VMEM((bb, tq, D), jnp.float32),   # output accumulator
            ],
        ),
        compiler_params=pltpu.CompilerParams(
            dimension_semantics=("parallel", "parallel", "arbitrary"),
            vmem_limit_bytes=vmem_limit,
        ),
        cost_estimate=cost,
    )(seed, q_bf, k_bf)


if __name__ == "__main__":
    key = jax.random.PRNGKey(0)
    kq, kk = jax.random.split(key)

    B, S, D = 2, 8, 32
    q = jax.random.normal(kq, (B, S, D), dtype=jnp.float32)
    k = jax.random.normal(kk, (B, S, D), dtype=jnp.float32)
    seed = jnp.array([0], dtype=jnp.int32)   # deterministic dropout seed

    out = attention_dropout(q, k, seed)
    jax.block_until_ready(out)

    assert out.shape == (B, S, D) and out.dtype == jnp.float32
    assert bool(jnp.all(jnp.isfinite(out)))

    # Loose sanity check vs. the no-dropout reference (dropout is unbiased).
    ref = jax.nn.softmax(
        (q @ jnp.swapaxes(k, -1, -2)) * (1.0 / math.sqrt(D)), axis=-1) @ k
    assert float(jnp.max(jnp.abs(out))) <= 10.0 * (float(jnp.max(jnp.abs(ref))) + 1.0)

    print("KERNEL_OK")
</pallas_src>

<mosaic_0001>
module attributes {stable_mosaic.version = 11 : i64} {
  func.func @_attn_dropout_kernel(%arg0: i32, %arg1: i32, %arg2: i32, %arg3: memref<1xi32, #tpu.memory_space<smem>>, %arg4: memref<1x8x32xbf16, #tpu.memory_space<vmem>>, %arg5: memref<1x8x32xbf16, #tpu.memory_space<vmem>>, %arg6: memref<1x8x32xf32, #tpu.memory_space<vmem>>, %arg7: memref<1x8x1xf32, #tpu.memory_space<vmem>>, %arg8: memref<1x8x1xf32, #tpu.memory_space<vmem>>, %arg9: memref<1x8x32xf32, #tpu.memory_space<vmem>>) attributes {dimension_semantics = [#tpu.dimension_semantics<parallel>, #tpu.dimension_semantics<parallel>, #tpu.dimension_semantics<arbitrary>], iteration_bounds = array<i64: 2, 1, 1>, scalar_prefetch = 1 : i64, scratch_operands = 3 : i64, tpu.core_type = #tpu.core_type<tc>, window_params = [{transform_indices = @transform_0, window_bounds = array<i64: 1, 8, 32>}, {transform_indices = @transform_1, window_bounds = array<i64: 1, 8, 32>}, {transform_indices = @transform_2, window_bounds = array<i64: 1, 8, 32>}]} {
    %c0_i32 = arith.constant 0 : i32
    %0 = arith.cmpi eq, %arg2, %c0_i32 : i32
    %1 = arith.extui %0 : i1 to i32
    %c0_i32_0 = arith.constant 0 : i32
    %2 = arith.cmpi ne, %1, %c0_i32_0 : i32
    scf.if %2 {
      %cst_44 = arith.constant 0xFF800000 : f32
      %98 = vector.broadcast %cst_44 : f32 to vector<1x8x1xf32>
      %c0_45 = arith.constant 0 : index
      %c0_46 = arith.constant 0 : index
      %c0_47 = arith.constant 0 : index
      %99 = vector.load %arg7[%c0_45, %c0_46, %c0_47] : memref<1x8x1xf32, #tpu.memory_space<vmem>>, vector<1x8x1xf32>
      tpu.vector_store %arg7[%c0_45, %c0_46, %c0_47], %98 {strides = array<i32>} : memref<1x8x1xf32, #tpu.memory_space<vmem>>, vector<1x8x1xf32>,
      %cst_48 = arith.constant 0.000000e+00 : f32
      %100 = vector.broadcast %cst_48 : f32 to vector<1x8x1xf32>
      %c0_49 = arith.constant 0 : index
      %c0_50 = arith.constant 0 : index
      %c0_51 = arith.constant 0 : index
      %101 = vector.load %arg8[%c0_49, %c0_50, %c0_51] : memref<1x8x1xf32, #tpu.memory_space<vmem>>, vector<1x8x1xf32>
      tpu.vector_store %arg8[%c0_49, %c0_50, %c0_51], %100 {strides = array<i32>} : memref<1x8x1xf32, #tpu.memory_space<vmem>>, vector<1x8x1xf32>,
      %cst_52 = arith.constant 0.000000e+00 : f32
      %102 = vector.broadcast %cst_52 : f32 to vector<1x8x32xf32>
      %c0_53 = arith.constant 0 : index
      %c0_54 = arith.constant 0 : index
      %c0_55 = arith.constant 0 : index
      %103 = vector.load %arg9[%c0_53, %c0_54, %c0_55] : memref<1x8x32xf32, #tpu.memory_space<vmem>>, vector<1x8x32xf32>
      tpu.vector_store %arg9[%c0_53, %c0_54, %c0_55], %102 {strides = array<i32>} : memref<1x8x32xf32, #tpu.memory_space<vmem>>, vector<1x8x32xf32>,
    } else {
    }
    %c0 = arith.constant 0 : index
    %c0_1 = arith.constant 0 : index
    %c0_2 = arith.constant 0 : index
    %3 = vector.load %arg4[%c0, %c0_1, %c0_2] : memref<1x8x32xbf16, #tpu.memory_space<vmem>>, vector<1x8x32xbf16>
    %c0_3 = arith.constant 0 : index
    %c0_4 = arith.constant 0 : index
    %c0_5 = arith.constant 0 : index
    %4 = vector.load %arg5[%c0_3, %c0_4, %c0_5] : memref<1x8x32xbf16, #tpu.memory_space<vmem>>, vector<1x8x32xbf16>
    %cst = arith.constant dense<0.000000e+00> : vector<1x8x8xf32>
    %5 = tpu.matmul %3, %4, %cst {dimension_numbers = #tpu.dot_dimension_numbers<[2], [2], [1], [1], [0, 0, 0, 1, 1, 1], [0], [0]>} : vector<1x8x32xbf16>, vector<1x8x32xbf16>, vector<1x8x8xf32> -> vector<1x8x8xf32>
    %c0_6 = arith.constant 0 : index
    %c0_7 = arith.constant 0 : index
    %c0_8 = arith.constant 0 : index
    %6 = vector.load %arg7[%c0_6, %c0_7, %c0_8] : memref<1x8x1xf32, #tpu.memory_space<vmem>>, vector<1x8x1xf32>
    %cst_9 = arith.constant dense<0xFF800000> : vector<1x8xf32>
    %7 = vector.multi_reduction <maximumf>, %5, %cst_9 [2] : vector<1x8x8xf32> to vector<1x8xf32>
    %8 = vector.shape_cast %7 : vector<1x8xf32> to vector<1x8x1xf32>
    %9 = arith.maximumf %6, %8 : vector<1x8x1xf32>
    %10 = arith.subf %6, %9 : vector<1x8x1xf32>
    %11 = math.exp %10 : vector<1x8x1xf32>
    %12 = vector.broadcast %9 : vector<1x8x1xf32> to vector<1x8x8xf32>
    %13 = arith.subf %5, %12 : vector<1x8x8xf32>
    %14 = math.exp %13 : vector<1x8x8xf32>
    %c0_10 = arith.constant 0 : index
    %c0_11 = arith.constant 0 : index
    %c0_12 = arith.constant 0 : index
    %15 = vector.load %arg8[%c0_10, %c0_11, %c0_12] : memref<1x8x1xf32, #tpu.memory_space<vmem>>, vector<1x8x1xf32>
    %16 = arith.mulf %11, %15 : vector<1x8x1xf32>
    %cst_13 = arith.constant dense<0.000000e+00> : vector<1x8xf32>
    %17 = vector.multi_reduction <add>, %14, %cst_13 [2] : vector<1x8x8xf32> to vector<1x8xf32>
    %18 = vector.shape_cast %17 : vector<1x8xf32> to vector<1x8x1xf32>
    %19 = arith.addf %16, %18 : vector<1x8x1xf32>
    %c0_14 = arith.constant 0 : index
    %c0_15 = arith.constant 0 : index
    %c0_16 = arith.constant 0 : index
    %20 = vector.load %arg8[%c0_14, %c0_15, %c0_16] : memref<1x8x1xf32, #tpu.memory_space<vmem>>, vector<1x8x1xf32>
    tpu.vector_store %arg8[%c0_14, %c0_15, %c0_16], %19 {strides = array<i32>} : memref<1x8x1xf32, #tpu.memory_space<vmem>>, vector<1x8x1xf32>,
    %c0_17 = arith.constant 0 : index
    %21 = memref.load %arg3[%c0_17] : memref<1xi32, #tpu.memory_space<smem>>
    %c1_i32 = arith.constant 1 : i32
    %22 = arith.muli %arg0, %c1_i32 : i32
    %c8_i32 = arith.constant 8 : i32
    %23 = arith.muli %arg1, %c8_i32 : i32
    %c8_i32_18 = arith.constant 8 : i32
    %24 = arith.muli %arg2, %c8_i32_18 : i32
    %25 = tpu.iota {dimensions = array<i32: 0>} : vector<1x8x1xi32>
    %26 = vector.broadcast %22 : i32 to vector<1x8x1xi32>
    %27 = arith.addi %25, %26 : vector<1x8x1xi32>
    %28 = tpu.iota {dimensions = array<i32: 1>} : vector<1x8x1xi32>
    %29 = vector.broadcast %23 : i32 to vector<1x8x1xi32>
    %30 = arith.addi %28, %29 : vector<1x8x1xi32>
    %c8_i32_19 = arith.constant 8 : i32
    %31 = vector.broadcast %c8_i32_19 : i32 to vector<1x8x1xi32>
    %32 = arith.muli %27, %31 : vector<1x8x1xi32>
    %33 = arith.addi %32, %30 : vector<1x8x1xi32>
    %c-1640531527_i32 = arith.constant -1640531527 : i32
    %34 = arith.muli %21, %c-1640531527_i32 : i32
    %35 = vector.broadcast %34 : i32 to vector<1x8x1xi32>
    %36 = arith.xori %33, %35 : vector<1x8x1xi32>
    %c16_i32 = arith.constant 16 : i32
    %37 = vector.broadcast %c16_i32 : i32 to vector<1x8x1xi32>
    %38 = arith.shrui %36, %37 : vector<1x8x1xi32>
    %39 = arith.xori %36, %38 : vector<1x8x1xi32>
    %c2146121005_i32 = arith.constant 2146121005 : i32
    %40 = vector.broadcast %c2146121005_i32 : i32 to vector<1x8x1xi32>
    %41 = arith.muli %39, %40 : vector<1x8x1xi32>
    %c15_i32 = arith.constant 15 : i32
    %42 = vector.broadcast %c15_i32 : i32 to vector<1x8x1xi32>
    %43 = arith.shrui %41, %42 : vector<1x8x1xi32>
    %44 = arith.xori %41, %43 : vector<1x8x1xi32>
    %c-2073254261_i32 = arith.constant -2073254261 : i32
    %45 = vector.broadcast %c-2073254261_i32 : i32 to vector<1x8x1xi32>
    %46 = arith.muli %44, %45 : vector<1x8x1xi32>
    %c16_i32_20 = arith.constant 16 : i32
    %47 = vector.broadcast %c16_i32_20 : i32 to vector<1x8x1xi32>
    %48 = arith.shrui %46, %47 : vector<1x8x1xi32>
    %49 = arith.xori %46, %48 : vector<1x8x1xi32>
    %50 = tpu.iota {dimensions = array<i32: 2>} : vector<1x1x8xi32>
    %51 = vector.broadcast %24 : i32 to vector<1x1x8xi32>
    %52 = arith.addi %50, %51 : vector<1x1x8xi32>
    %c-1640531527_i32_21 = arith.constant -1640531527 : i32
    %53 = vector.broadcast %c-1640531527_i32_21 : i32 to vector<1x1x8xi32>
    %54 = arith.muli %52, %53 : vector<1x1x8xi32>
    %c1_i32_22 = arith.constant 1 : i32
    %55 = vector.broadcast %c1_i32_22 : i32 to vector<1x1x8xi32>
    %56 = arith.addi %54, %55 : vector<1x1x8xi32>
    %c16_i32_23 = arith.constant 16 : i32
    %57 = vector.broadcast %c16_i32_23 : i32 to vector<1x1x8xi32>
    %58 = arith.shrui %56, %57 : vector<1x1x8xi32>
    %59 = arith.xori %56, %58 : vector<1x1x8xi32>
    %c2146121005_i32_24 = arith.constant 2146121005 : i32
    %60 = vector.broadcast %c2146121005_i32_24 : i32 to vector<1x1x8xi32>
    %61 = arith.muli %59, %60 : vector<1x1x8xi32>
    %c15_i32_25 = arith.constant 15 : i32
    %62 = vector.broadcast %c15_i32_25 : i32 to vector<1x1x8xi32>
    %63 = arith.shrui %61, %62 : vector<1x1x8xi32>
    %64 = arith.xori %61, %63 : vector<1x1x8xi32>
    %c-2073254261_i32_26 = arith.constant -2073254261 : i32
    %65 = vector.broadcast %c-2073254261_i32_26 : i32 to vector<1x1x8xi32>
    %66 = arith.muli %64, %65 : vector<1x1x8xi32>
    %c16_i32_27 = arith.constant 16 : i32
    %67 = vector.broadcast %c16_i32_27 : i32 to vector<1x1x8xi32>
    %68 = arith.shrui %66, %67 : vector<1x1x8xi32>
    %69 = arith.xori %66, %68 : vector<1x1x8xi32>
    %70 = vector.broadcast %49 : vector<1x8x1xi32> to vector<1x8x8xi32>
    %71 = vector.broadcast %69 : vector<1x1x8xi32> to vector<1x8x8xi32>
    %72 = arith.addi %70, %71 : vector<1x8x8xi32>
    %c16_i32_28 = arith.constant 16 : i32
    %73 = vector.broadcast %c16_i32_28 : i32 to vector<1x8x8xi32>
    %74 = arith.shrui %72, %73 : vector<1x8x8xi32>
    %75 = arith.xori %72, %74 : vector<1x8x8xi32>
    %c2146121005_i32_29 = arith.constant 2146121005 : i32
    %76 = vector.broadcast %c2146121005_i32_29 : i32 to vector<1x8x8xi32>
    %77 = arith.muli %75, %76 : vector<1x8x8xi32>
    %c15_i32_30 = arith.constant 15 : i32
    %78 = vector.broadcast %c15_i32_30 : i32 to vector<1x8x8xi32>
    %79 = arith.shrui %77, %78 : vector<1x8x8xi32>
    %80 = arith.xori %77, %79 : vector<1x8x8xi32>
    %c2147483647_i32 = arith.constant 2147483647 : i32
    %81 = vector.broadcast %c2147483647_i32 : i32 to vector<1x8x8xi32>
    %82 = arith.andi %80, %81 : vector<1x8x8xi32>
    %c214748364_i32 = arith.constant 214748364 : i32
    %83 = vector.broadcast %c214748364_i32 : i32 to vector<1x8x8xi32>
    %84 = arith.cmpi sge, %82, %83 : vector<1x8x8xi32>
    %cst_31 = arith.constant 0.000000e+00 : f32
    %85 = vector.broadcast %cst_31 : f32 to vector<1x8x8xf32>
    %86 = arith.select %84, %14, %85 : vector<1x8x8xi1>, vector<1x8x8xf32>
    %87 = arith.truncf %86 : vector<1x8x8xf32> to vector<1x8x8xbf16>
    %c0_32 = arith.constant 0 : index
    %c0_33 = arith.constant 0 : index
    %c0_34 = arith.constant 0 : index
    %88 = vector.load %arg9[%c0_32, %c0_33, %c0_34] : memref<1x8x32xf32, #tpu.memory_space<vmem>>, vector<1x8x32xf32>
    %89 = vector.broadcast %11 : vector<1x8x1xf32> to vector<1x8x32xf32>
    %90 = arith.mulf %89, %88 : vector<1x8x32xf32>
    %cst_35 = arith.constant dense<0.000000e+00> : vector<1x8x32xf32>
    %91 = tpu.matmul %87, %4, %cst_35 {dimension_numbers = #tpu.dot_dimension_numbers<[2], [1], [1], [2], [0, 0, 0, 1, 1, 2], [0], [0]>} : vector<1x8x8xbf16>, vector<1x8x32xbf16>, vector<1x8x32xf32> -> vector<1x8x32xf32>
    %92 = arith.addf %90, %91 : vector<1x8x32xf32>
    %c0_36 = arith.constant 0 : index
    %c0_37 = arith.constant 0 : index
    %c0_38 = arith.constant 0 : index
    %93 = vector.load %arg9[%c0_36, %c0_37, %c0_38] : memref<1x8x32xf32, #tpu.memory_space<vmem>>, vector<1x8x32xf32>
    tpu.vector_store %arg9[%c0_36, %c0_37, %c0_38], %92 {strides = array<i32>} : memref<1x8x32xf32, #tpu.memory_space<vmem>>, vector<1x8x32xf32>,
    %c0_39 = arith.constant 0 : index
    %c0_40 = arith.constant 0 : index
    %c0_41 = arith.constant 0 : index
    %94 = vector.load %arg7[%c0_39, %c0_40, %c0_41] : memref<1x8x1xf32, #tpu.memory_space<vmem>>, vector<1x8x1xf32>
    tpu.vector_store %arg7[%c0_39, %c0_40, %c0_41], %9 {strides = array<i32>} : memref<1x8x1xf32, #tpu.memory_space<vmem>>, vector<1x8x1xf32>,
    %c0_i32_42 = arith.constant 0 : i32
    %95 = arith.cmpi eq, %arg2, %c0_i32_42 : i32
    %96 = arith.extui %95 : i1 to i32
    %c0_i32_43 = arith.constant 0 : i32
    %97 = arith.cmpi ne, %96, %c0_i32_43 : i32
    scf.if %97 {
      %c0_44 = arith.constant 0 : index
      %c0_45 = arith.constant 0 : index
      %c0_46 = arith.constant 0 : index
      %98 = vector.load %arg8[%c0_44, %c0_45, %c0_46] : memref<1x8x1xf32, #tpu.memory_space<vmem>>, vector<1x8x1xf32>
      %99 = tpu.reciprocal %98 {approx = true} : vector<1x8x1xf32> -> vector<1x8x1xf32>
      %cst_47 = arith.constant 1.11111116 : f32
      %100 = vector.broadcast %cst_47 : f32 to vector<1x8x1xf32>
      %101 = arith.mulf %99, %100 : vector<1x8x1xf32>
      %c0_48 = arith.constant 0 : index
      %c0_49 = arith.constant 0 : index
      %c0_50 = arith.constant 0 : index
      %102 = vector.load %arg9[%c0_48, %c0_49, %c0_50] : memref<1x8x32xf32, #tpu.memory_space<vmem>>, vector<1x8x32xf32>
      %103 = vector.broadcast %101 : vector<1x8x1xf32> to vector<1x8x32xf32>
      %104 = arith.mulf %102, %103 : vector<1x8x32xf32>
      %c0_51 = arith.constant 0 : index
      %c0_52 = arith.constant 0 : index
      %c0_53 = arith.constant 0 : index
      %105 = vector.load %arg6[%c0_51, %c0_52, %c0_53] : memref<1x8x32xf32, #tpu.memory_space<vmem>>, vector<1x8x32xf32>
      tpu.vector_store %arg6[%c0_51, %c0_52, %c0_53], %104 {strides = array<i32>} : memref<1x8x32xf32, #tpu.memory_space<vmem>>, vector<1x8x32xf32>,
    } else {
    }
    return
  }
  func.func @transform_0(%arg0: i32, %arg1: i32, %arg2: i32, %arg3: memref<1xi32, #tpu.memory_space<smem>>) -> (i32, i32, i32) {
    %c0_i32 = arith.constant 0 : i32
    %c0_i32_0 = arith.constant 0 : i32
    return %arg0, %arg1, %c0_i32 : i32, i32, i32
  }
  func.func @transform_1(%arg0: i32, %arg1: i32, %arg2: i32, %arg3: memref<1xi32, #tpu.memory_space<smem>>) -> (i32, i32, i32) {
    %c0_i32 = arith.constant 0 : i32
    %c0_i32_0 = arith.constant 0 : i32
    return %arg0, %arg2, %c0_i32 : i32, i32, i32
  }
  func.func @transform_2(%arg0: i32, %arg1: i32, %arg2: i32, %arg3: memref<1xi32, #tpu.memory_space<smem>>) -> (i32, i32, i32) {
    %c0_i32 = arith.constant 0 : i32
    %c0_i32_0 = arith.constant 0 : i32
    return %arg0, %arg1, %c0_i32 : i32, i32, i32
  }
}

</mosaic_0001>

<bundles_post_ra>
// kernel: tpu_custom_call.1
= control target key start
LH: loop header
LB: loop body
LE: loop exit
PB: predicated region body
PF: predicated region fallthrough
CT: control target
= control target key end

     0   :  { %s1071_s0 = inlined_call_operand.<no memory space> [shape: s32[1], index: 0, kind: input, shape index: {}]   ;;  %s1072_s1 = inlined_call_operand.hbm [shape: bf16[2,8,32], index: 1, kind: input, shape index: {}]   ;;  %s1073_s2 = inlined_call_operand.hbm [shape: bf16[2,8,32], index: 2, kind: input, shape index: {}]   ;;  %s1074_s3 = inlined_call_operand.hbm [shape: f32[2,8,32], index: 3, kind: output, shape index: {}]  }
   0x1   :  { %8 = sst [smem:[#allocation6]] %s1071_s0 }
   0x2   :  { %9 = vsyncpa [#allocation8], 0 }
   0x3   :  { %11 = vsyncpa [#allocation8 + $0x1], 0 }
   0x4   :  { %12 = vsyncpa [#allocation11], 0 }
   0x5   :  { %14 = vsyncpa [#allocation11 + $0x1], 0 }
   0x6   :  { %15 = vsyncpa [#allocation9], 0 }
   0x7   :  { %17 = vsyncpa [#allocation9 + $0x1], 0  ;;  %s837_s14 = smov 0   ;;  %s839_s15 = smov 0  }
   0x8   :  { %s841_s16 = smov 0   ;;  %s843_s17 = smov 0  }
   0x9   :  { %s845_s18 = smov 0   ;;  %s847_s19 = smov 0  }
   0xa LB: > { %s546_s0 = sadd.s32 4294967295, %s805_s19   ;;  %s547_s20 = sadd.s32 4294967294, %s805_s19   ;;  %s805_s19 = sphi %s847_s19, %s23_s19   ;;  %s801_s18 = sphi %s845_s18, %s1094_s18   ;;  %s797_s17 = sphi %s843_s17, %s1093_s17   ;;  %s793_s16 = sphi %s841_s16, %s1092_s16   ;;  %s789_s15 = sphi %s839_s15, %s1091_s15   ;;  %s785_s14 = sphi %s837_s14, %s1090_s14  }
   0xb   : > { %s42_s21 = sadd.s32 1, %s801_s18  ;;  %s51_s22 = sadd.s32 1, %s793_s16 }
   0xc   : > { %p44_p0 = scmp.ge.s32.totalorder %s42_s21, 2  ;;  %p58_p1 = scmp.ne.s32.totalorder %s793_s16, %s789_s15 }
   0xd   : > { %p59_p2 = scmp.eq.s32.totalorder %s805_s19, 0  ;;  %p64_p3 = scmp.ne.s32.totalorder %s789_s15, %s785_s14 }
   0xe   : > { %s1096_s21 = smov (%p44_p0, %s42_s21), 0  ;;  %p65_p5 = scmp.eq.s32.totalorder %s546_s0, 0 }
   0xf   : > { %p878_p4 = por %p59_p2, %p58_p1  ;;  %s46_s24 = ssub.s32 %s801_s18, %s1096_s21 }
  0x10   : > { %p118_p6 = scmp.eq.s32.totalorder %s546_s0, 1  ;;  %p49_p7 = scmp.eq.s32.totalorder %s46_s24, 0 }
  0x11   : > { %p884_p8 = por %p65_p5, %p64_p3  ;;  %p124_p10 = scmp.eq.s32.totalorder %s547_s20, 1 }
  0x12   : > { %p888_p9 = por %p118_p6, %p58_p1  ;;  %p597_p13 = scmp.lt.s32.totalorder %s805_s19, 2 }
  0x13   : > { %s1078_s25 = scalar_select %p884_p8, 1, 0 }
  0x14   : > { %s1079_s26 = scalar_select %p888_p9, 1, 0 }
  0x15   : > { %s893_s27 = scalar_select %p49_p7, %s793_s16, %s51_s22  }
  0x16   : > { %p895_p11 = por %p124_p10, %p64_p3  ;;  %s902_s29 = sand.u32 1, %s793_s16  }
  0x17   : > { %s550_s30 = sshll.u32 %s902_s29, 2  ;;  %s551_s4 = sshll.u32 %s801_s18, 6 }
  0x18   : > { %s1080_s28 = scalar_select %p895_p11, 1, 0 }
  0x19   : > { %s911_s7 = scalar_lea.hbm %s1072_s1, %s551_s4  ;;  %s148_s8 = scalar_lea.vmem [#allocation7], %s550_s30 }
  0x1a   : > { %s156_s9 = sshll.u32 %s148_s8, 4  ;;  %p919_p0 = pnand %p597_p13, %p878_p4  ;;  %s915_s9 = int_to_ptr.vmem [resolvable:$true] %s156_s9 }
  0x1b   : > { %s145_s11 = scalar_lea.sflag [#allocation8], %s902_s29  ;;  %s659_s12 = scalar_lea.hbm %s911_s7, 64 }
  0x1c   : > { %p660_p3 = scmp.ne.s32.totalorder %s911_s7, %s659_s12  ;;  %p661_p5 = pneg %p919_p0 }
  0x1d   : > { %s664_s20 = scalar_lea.hbm %s1072_s1, 128  ;;  %p665_p4 = scmp.lt.u32.totalorder %s911_s7, %s1072_s1 }
  0x1e   : > { %p662_p6 = pnand %p661_p5, %p660_p3  ;;  %p666_p10 = scmp.lt.u32.totalorder %s664_s20, %s659_s12 }
  0x1f   : > { %p668_p12 = scmp.lt.u32.totalorder %s659_s12, %s911_s7 }
  0x20   : > { %p663_p7 = pneg %p662_p6  ;;  %p667_p13 = por %p666_p10, %p665_p4 }
  0x22   : > { %p669_p1 = por %p668_p12, %p667_p13 }
  0x24   : > { %p670_p2 = pnand %p669_p1, %p663_p7 }
  0x26   : > { %673 = shalt.err (!%p670_p2)
}
  0x27   : > { %s674_s24 = scalar_lea.vmem %s915_s9, 64  ;;  %s807_s5 = smov [#allocation7]  }
  0x28   : > { %p675_p3 = scmp.ne.s32.totalorder %s915_s9, %s674_s24  ;;  %s679_s6 = sshll.u32 %s807_s5, 4  ;;  %s680_s6 = int_to_ptr.vmem [resolvable:$false] %s679_s6 }
  0x29   : > { %s681_s8 = scalar_lea.vmem %s680_s6, 128  ;;  %p682_p9 = scmp.lt.s32.totalorder %s915_s9, %s680_s6 }
  0x2a   : > { %p677_p6 = pnand %p675_p3, %p661_p5  ;;  %p683_p4 = scmp.lt.s32.totalorder %s681_s8, %s674_s24 }
  0x2c   : > { %p678_p11 = pneg %p677_p6  ;;  %p684_p10 = por %p683_p4, %p682_p9 }
  0x2e   : > { %p685_p12 = pnand %p684_p10, %p678_p11 }
  0x30   : > { %688 = shalt.err (!%p685_p12)
}
  0x31   : > { %589 = dma.hbm_to_vmem [thread:$0]  (!%p919_p0), %s911_s7, 64, %s915_s9, %s145_s11  }
  0x32   : > { %p1082_p1 = scmp.lt.s32.totalorder %s805_s19, 3  ;;  %p1083_p2 = scmp.ge.s32.totalorder %s805_s19, 1 }
  0x33   : > { %s964_s20 = scalar_lea.hbm %s1073_s2, %s551_s4  ;;  %s167_s22 = scalar_lea.vmem [#allocation10], %s550_s30 }
  0x34   : > { %p955_p7 = pnand %p1083_p2, %p1082_p1  ;;  %s175_s23 = sshll.u32 %s167_s22, 4  ;;  %s176_s23 = int_to_ptr.vmem [resolvable:$true] %s175_s23 }
  0x35   : > { %s164_s7 = scalar_lea.sflag [#allocation11], %s902_s29  ;;  %s689_s9 = scalar_lea.hbm %s964_s20, 64 }
  0x36   : > { %s1084_s12 = scalar_select %p955_p7, 1, 0 }
  0x37   : > { %p690_p9 = scmp.ne.s32.totalorder %s964_s20, %s689_s9  ;;  %s694_s4 = scalar_lea.hbm %s1073_s2, 128 }
  0x38   : > { %p695_p3 = scmp.lt.u32.totalorder %s964_s20, %s1073_s2  ;;  %p696_p6 = scmp.lt.u32.totalorder %s694_s4, %s689_s9 }
  0x39   : > { %p692_p11 = pnand %p690_p9, %p661_p5  ;;  %p698_p10 = scmp.lt.u32.totalorder %s689_s9, %s964_s20 }
  0x3a   : > { %p697_p4 = por %p696_p6, %p695_p3 }
  0x3b   : > { %p693_p13 = pneg %p692_p11 }
  0x3c   : > { %p699_p12 = por %p698_p10, %p697_p4 }
  0x3e   : > { %p700_p1 = pnand %p699_p12, %p693_p13 }
  0x40   : > { %703 = shalt.err (!%p700_p1)
}
  0x41   : > { %s704_s29 = scalar_lea.vmem %s176_s23, 64  ;;  %s808_s30 = smov [#allocation10]  }
  0x42   : > { %p705_p2 = scmp.ne.s32.totalorder %s176_s23, %s704_s29  ;;  %s709_s8 = sshll.u32 %s808_s30, 4  ;;  %s710_s8 = int_to_ptr.vmem [resolvable:$false] %s709_s8 }
  0x43   : > { %s711_s13 = scalar_lea.vmem %s710_s8, 128  ;;  %p712_p8 = scmp.lt.s32.totalorder %s176_s23, %s710_s8 }
  0x44   : > { %p707_p9 = pnand %p705_p2, %p661_p5  ;;  %p713_p7 = scmp.lt.s32.totalorder %s711_s13, %s704_s29 }
  0x46   : > { %p708_p11 = pneg %p707_p9  ;;  %p714_p3 = por %p713_p7, %p712_p8 }
  0x48   : > { %p715_p6 = pnand %p714_p3, %p708_p11 }
  0x4a   : > { %718 = shalt.err (!%p715_p6)
}
  0x4b   : > { %592 = dma.hbm_to_vmem [thread:$0]  (!%p919_p0), %s964_s20, 64, %s176_s23, %s164_s7  }
  0x4c   : > { %p1085_p13 = scmp.ne.s32.totalorder %s1084_s12, 0 }
  0x4d   : > { %s991_s0 = sand.u32 (!%p1085_p13), 1, %s789_s15   ;;  %p1086_p5 = scmp.ne.s32.totalorder (!%p1085_p13), %s1078_s25, 0 }
  0x4e   : > { %184 = sbr.rel (%p1085_p13) target bundleno = 908 (0x38c), region = 28  ;;  %s555_s22 = sshll.u32 (!%p1085_p13), %s991_s0, 2 }
  0x4f   : > { %s187_s9 = scalar_lea.sflag (!%p1085_p13), [#allocation8], %s991_s0  ;;  %s190_s11 = scalar_lea.vmem (!%p1085_p13), [#allocation7], %s555_s22 }
  0x55   : > { %772 = dma.done.wait (%p1086_p5), %s187_s9, 64  }
  0x56   : > { %774 = vsyncadd (%p1086_p5), %s187_s9, 4294967232  ;;  %s196_s10 = scalar_lea.sflag [#allocation11], %s991_s0  ;;  %s199_s20 = scalar_lea.vmem [#allocation10], %s555_s22 }
  0x57   : > { %776 = dma.done.wait (%p1086_p5), %s196_s10, 64  }
  0x58   : > { %778 = vsyncadd (%p1086_p5), %s196_s10, 4294967232  ;;  %vm233_vm0 = vcmask 261120   ;;  %v809_v0 = vmov 0.0   ;;  %vm810_vm1 = vmmov 0   ;;  %v236_v1 = vld [vmem:[%s199_s20] sm:$0xf]  ;;  %v313_v16 = vlaneseq }
  0x59   : > { %568 = vmatprep.subr.bf16.mxu0 %v809_v0  ;;  %234 = vst.msk [vmem:[#allocation4] sm:$0xff] %vm233_vm0, %v809_v0  ;;  %570 = vmatprep.mubr.msk.bf16.mxu0 %vm810_vm1, %v809_v0  ;;  %v242_v2 = vsel %vm233_vm0, %v236_v1, 0  ;;  %v235_v3 = vld [vmem:[%s190_s11] sm:$0xf]  ;;  %vm230_vm2 = vcmask 7168   ;;  %v811_v4 = vmov -inf   ;;  %v312_v17 = vstv %s797_s17 }
  0x5a   : > { %574 = vmatprep.subr.bf16.mxu1 %v809_v0  ;;  %576 = vmatprep.mubr.msk.bf16.mxu1 %vm810_vm1, %v809_v0  ;;  %231 = vst.msk [vmem:[#allocation2] sm:$0xff] %vm230_vm2, %v811_v4  ;;  %232 = vst.msk [vmem:[#allocation3] sm:$0xff] %vm230_vm2, %v809_v0  ;;  %vm285_vm3 = vcmask 64512   ;;  %v812_v10 = vmov 0   ;;  %vm364_vm4 = vcmask 1043456   ;;  %s309_s25 = sld [smem:[#allocation6]] }
  0x5b   : > { %569 = vmatpush3.bf16.xpose.msra.mxu0 %v242_v2  ;;  %651 = vset.pattern.permute.xlu0 %v812_v10  ;;  %v365_v15 = vsel %vm364_vm4, %v236_v1, 0  ;;  %v314_v18 = vshrl.u32 %v313_v16, 7  ;;  %v317_v19 = vmul.u32 8, %v312_v17  ;;  %v331_v20 = vand.u32 127, %v313_v16  ;;  %s557_s23 = sshll.u32 %s991_s0, 3  ;;  %s561_s7 = sshll.u32 %s797_s17, 7 }
  0x5c   : > { %652 = vset.pattern.permute.xlu1 %v812_v10  ;;  %575 = vmatpush3.bf16.msra.mxu1 %v365_v15  ;;  %s224_s24 = scalar_lea.vmem [#allocation12], %s557_s23  ;;  %s1021_s29 = scalar_lea.hbm %s1074_s3, %s561_s7 }
  0x5d   : > { %v318_v21 = vadd.s32 %v317_v19, %v314_v18  ;;  %v334_v22 = vmul.u32 2654435769, %v331_v20  ;;  %s439_s4 = sshll.u32 %s224_s24, 4  ;;  %s425_s30 = scalar_lea.sflag [#allocation9], %s991_s0  ;;  %s1023_s4 = int_to_ptr.vmem [resolvable:$true] %s439_s4 }
  0x5e   : > { %s719_s8 = scalar_lea.vmem %s1023_s4, 128  ;;  %p1087_p0 = scmp.ne.s32.totalorder %s1079_s26, 0 }
  0x5f   : > { %v335_v25 = vadd.s32 1, %v334_v22  ;;  %p720_p8 = scmp.ne.s32.totalorder %s1023_s4, %s719_s8  ;;  %s813_s17 = smov [#allocation12]  }
  0x60   : > { %s319_s12 = smul.u32 2654435769, %s309_s25  ;;  %v354_v1 = vld [vmem:[#allocation4] sm:$0xff]  ;;  %s723_s13 = sshll.u32 %s813_s17, 4  ;;  %s724_s13 = int_to_ptr.vmem [resolvable:$false] %s723_s13 }
  0x61   : > { %v284_v11 = vld [vmem:[#allocation2] sm:$0xff]  ;;  %v336_v27 = vshrl.u32 %v335_v25, 16  ;;  %v301_v58 = vld [vmem:[#allocation3] sm:$0xff]  ;;  %p721_p7 = pnand %p720_p8, %p1087_p0  ;;  %s725_s22 = scalar_lea.vmem %s724_s13, 256 }
  0x62   : > { %571 = vmatmul.mubr.msk.bf16.vlgmr.msra.gmra.mrb[0].mxu0 %vm233_vm0, %v235_v3  ;;  %v320_v23 = vstv %s319_s12  ;;  %p726_p10 = scmp.lt.s32.totalorder %s1023_s4, %s724_s13  ;;  %p727_p12 = scmp.lt.s32.totalorder %s725_s22, %s719_s8 }
  0x63   : > { %v321_v24 = vxor.u32 %v320_v23, %v318_v21  ;;  %v337_v29 = vxor.u32 %v336_v27, %v335_v25  ;;  %p722_p4 = pneg %p721_p7 }
  0x64   : > { %p728_p1 = por %p727_p12, %p726_p10 }
  0x65   : > { %v322_v26 = vshrl.u32 %v321_v24, 16  ;;  %v338_v31 = vmul.u32 2146121005, %v337_v29 }
  0x66   : > { %p729_p2 = pnand %p728_p1, %p722_p4 }
  0x67   : > { %v323_v28 = vxor.u32 %v322_v26, %v321_v24  ;;  %v339_v33 = vshrl.u32 %v338_v31, 15 }
  0x69   : > { %v324_v30 = vmul.u32 2146121005, %v323_v28  ;;  %v340_v35 = vxor.u32 %v339_v33, %v338_v31 }
  0x6b   : > { %v325_v32 = vshrl.u32 %v324_v30, 15  ;;  %v341_v37 = vmul.u32 2221713035, %v340_v35 }
  0x6d   : > { %v326_v34 = vxor.u32 %v325_v32, %v324_v30  ;;  %v342_v39 = vshrl.u32 %v341_v37, 16 }
  0x6f   : > { %v327_v36 = vmul.u32 2221713035, %v326_v34  ;;  %v343_v41 = vxor.u32 %v342_v39, %v341_v37 }
  0x71   : > { %v328_v38 = vshrl.u32 %v327_v36, 16 }
  0x73   : > { %v329_v40 = vxor.u32 %v328_v38, %v327_v36 }
  0x75   : > { %v344_v42 = vadd.s32 %v343_v41, %v329_v40 }
  0x77   : > { %v345_v43 = vshrl.u32 %v344_v42, 16 }
  0x79   : > { %v346_v44 = vxor.u32 %v345_v43, %v344_v42 }
  0x7b   : > { %v347_v45 = vmul.u32 2146121005, %v346_v44 }
  0x7d   : > { %v348_v48 = vshrl.u32 %v347_v45, 15 }
  0x7f   : > { %v349_v50 = vxor.u32 %v348_v48, %v347_v45 }
  0x81   : > { %v350_v51 = vand.u32 2147483647, %v349_v50 }
  0x83   : > { %vm351_vm5 = vcmp.ge.s32.totalorder %v350_v51, 214748364 }
 0x135   : > { %v278_v5 = vpop.f32.mrb[0].mxu0 }
 0x136   : > { %v572_v6 = vpop.f32.mrb[1].mxu0  ;;  %v286_v7 = vsel %vm285_vm3, %v278_v5, -inf }
 0x137   : > { %287 = vmax.xlane.f32.xlu0 %v286_v7  ;;  %v281_v8 = vpop.f32.mrb[2].mxu0 }
 0x138   : > { %v573_v9 = vpop.f32.mrb[3].mxu0 }
 0x1c4   : > { %v288_v12 = vpop.xlane.xlu0 %287 }
 0x1c5   : > { %v289_v13 = vmax.f32 %v284_v11, %v288_v12 }
 0x1c7   : > { %v290_v14 = vsub.f32 %v284_v11, %v289_v13  ;;  %409 = vst.msk [vmem:[#allocation2] sm:$0xff] %vm230_vm2, %v289_v13  ;;  %295 = vperm.xlu0 %651, %v289_v13  }
 0x1c9   : > { %v291_v56 = vmul.f32 1.442695, %v290_v14 }
 0x246   : > { %v296_v46 = vpop.permute.xlu0 %295 }
 0x247   : > { %v298_v47 = vsub.f32 %v278_v5, %v296_v46 }
 0x249   : > { %v299_v49 = vmul.f32 1.442695, %v298_v47 }
 0x24b   : > { %653 = vpow2.f32 %v299_v49 }
 0x24c   : > { %655 = vpow2.f32 %v291_v56 }
 0x255   : > { %v654_v52 = vpop.eup %653 }
 0x256   : > { %v303_v53 = vsel %vm285_vm3, %v654_v52, 0.0  ;;  %v352_v54 = vsel %vm351_vm5, %v654_v52, 0.0  ;;  %v656_v57 = vpop.eup %655 }
 0x257   : > { %304 = vadd.xlane.f32.xlu1 %v303_v53  ;;  %v353_v55 = vpack.c.bf16 %v352_v54, %v352_v54  ;;  %v302_v59 = vmul.f32 %v656_v57, %v301_v58 }
 0x259   : > { %577 = vmatmul.mubr.msk.bf16.vlgmr.msra.gmra.mrb[0].mxu1 %vm285_vm3, %v353_v55 }
 0x268   : > { %357 = vperm.xlu1 %652, %v656_v57  }
 0x2e4   : > { %v305_v60 = vpop.xlane.xlu1 %304 }
 0x2e5   : > { %v306_v61 = vadd.f32 %v305_v60, %v302_v59 }
 0x2e7   : > { %308 = vst.msk [vmem:[#allocation3] sm:$0xff] %vm230_vm2, %v306_v61 }
 0x2e8   : > { %v358_v2 = vpop.permute.xlu1 %357 }
 0x2e9   : > { %v360_v3 = vmul.f32 %v358_v2, %v354_v1 }
 0x2ee   : > { %v413_v62 = vld [vmem:[#allocation3] sm:$0xff] }
 0x2ef   : > { %657 = vrcp.f32 %v413_v62 }
 0x2f9   : > { %v658_v63 = vpop.eup %657 }
 0x2fa   : > { %v415_v0 = vmul.f32 1.1111112, %v658_v63 }
 0x2fc   : > { %419 = vperm.xlu1 %652, %v415_v0  }
 0x32c   : > { %v401_v4 = vpop.f32.mrb[0].mxu1 }
 0x32d   : > { %v407_v5 = vadd.f32 %v401_v4, %v360_v3  ;;  %v578_v6 = vpop.f32.mrb[1].mxu1 }
 0x32e   : > { %v404_v7 = vpop.f32.mrb[2].mxu1 }
 0x32f   : > { %408 = vst.msk [vmem:[#allocation4] sm:$0xff] %vm233_vm0, %v407_v5  ;;  %v579_v8 = vpop.f32.mrb[3].mxu1 }
 0x336   : > { %v416_v9 = vld [vmem:[#allocation4] sm:$0xff] }
 0x37b   : > { %v420_v10 = vpop.permute.xlu1 %419 }
 0x37c   : > { %v422_v11 = vmul.f32 %v420_v10, %v416_v9 }
 0x37e   : > { %423 = vst.msk [vmem:[%s224_s24] sm:$0xff] %vm233_vm0, %v422_v11 }
 0x37f   : > { %732 = shalt.err (!%p729_p2)
}
 0x380   : > { %s733_s0 = scalar_lea.hbm %s1021_s29, 128  ;;  %s737_s10 = scalar_lea.hbm %s1074_s3, 256 }
 0x381   : > { %p734_p9 = scmp.ne.s32.totalorder %s1021_s29, %s733_s0  ;;  %p738_p6 = scmp.lt.u32.totalorder %s1021_s29, %s1074_s3 }
 0x382   : > { %p739_p13 = scmp.lt.u32.totalorder %s737_s10, %s733_s0  ;;  %p741_p8 = scmp.lt.u32.totalorder %s733_s0, %s1021_s29 }
 0x383   : > { %p735_p11 = pnand %p734_p9, %p1087_p0 }
 0x384   : > { %p740_p5 = por %p739_p13, %p738_p6 }
 0x385   : > { %p736_p3 = pneg %p735_p11 }
 0x386   : > { %p742_p7 = por %p741_p8, %p740_p5 }
 0x388   : > { %p743_p4 = pnand %p742_p7, %p736_p3 }
 0x38a   : > { %746 = shalt.err (!%p743_p4)
}
 0x38b   : > { %584 = dma.vmem_to_hbm [thread:$0]  (%p1087_p0), %s1023_s4, 128, %s1021_s29, %s425_s30  }
 0x38c PF: > { %s451_s12 = sand.u32 1, %s785_s14   ;;  %p1088_p10 = scmp.ne.s32.totalorder %s1080_s28, 0 }
 0x38d   : > { %p1089_p12 = scmp.ge.s32.totalorder %s805_s19, 2  ;;  %s452_s23 = scalar_lea.sflag [#allocation9], %s451_s12 }
 0x38f   : > { %p594_p1 = pnand %p1089_p12, %p1088_p10 }
 0x391   : > { %780 = dma.done.wait (!%p594_p1), %s452_s23, 128  }
 0x392   : > { %782 = vsyncadd (!%p594_p1), %s452_s23, 4294967168  ;;  %s23_s19 = sadd.s32 1, %s805_s19   ;;  %s1090_s14 = smov %s789_s15 }
 0x393   : > { %p20_p2 = scmp.ge.s32.totalorder %s23_s19, 4   ;;  %s1091_s15 = smov %s793_s16 }
 0x394   : > { %s1092_s16 = smov %s893_s27  ;;  %s1093_s17 = smov %s801_s18 }
 0x395   : > { %s1094_s18 = smov %s1096_s21  ;;  %22 = sbr.rel (!%p20_p2) target bundleno = 10 (0xa), region = 94 }
 0x39c   :  { %457 = vsyncpa [#allocation8], 1 }
 0x39d   :  { %459 = vsyncpa [#allocation8 + $0x1], 1 }
 0x39e   :  { %460 = vsyncpa [#allocation11], 1 }
 0x39f   :  { %462 = vsyncpa [#allocation11 + $0x1], 1 }
 0x3a0   :  { %463 = vsyncpa [#allocation9], 1 }
 0x3a1   :  { %465 = vsyncpa [#allocation9 + $0x1], 1 }

</bundles_post_ra>
